<compile_context>
chip_gen: v7x
topology: tpu7x:2x2x1
jax: 0.10.0
libtpu: 0.0.40
codegen_flags: <defaults>
</compile_context>

<pallas_src>
import functools

import jax
import jax.numpy as jnp
from jax.experimental import pallas as pl
from jax.experimental.pallas import tpu as pltpu

BN_EPS = 1e-5
LANE = 128


def _round_up(n, m):
    return ((n + m - 1) // m) * m


# ----------------------------- kernel helpers -----------------------------
def _batchnorm_train(h, gamma, beta):
    """Training-mode BatchNorm1d: single-pass batch stats + fused scale/shift."""
    inv_n = 1.0 / h.shape[0]
    mean = jnp.sum(h, axis=0, keepdims=True) * inv_n
    mean_sq = jnp.sum(h * h, axis=0, keepdims=True) * inv_n
    var = jnp.maximum(mean_sq - mean * mean, 0.0)        # biased variance
    scale = gamma * jax.lax.rsqrt(var + BN_EPS)
    shift = beta - mean * scale
    return h * scale + shift


def _masked_softmax(logits, real_dim):
    """Row softmax over the first `real_dim` lanes of a lane-padded slab."""
    padded_dim = logits.shape[-1]
    if real_dim == padded_dim:
        valid = None
        masked = logits
    else:
        col = jax.lax.broadcasted_iota(jnp.int32, logits.shape, 1)
        valid = col < real_dim
        masked = jnp.where(valid, logits, -jnp.inf)
    m = jnp.max(masked, axis=1, keepdims=True)
    e = jnp.exp(logits - m)
    if valid is not None:
        e = jnp.where(valid, e, 0.0)
    s = jnp.sum(e, axis=1, keepdims=True)
    r = pl.reciprocal(s, approx=True)     # EUP slot (otherwise idle)
    r = r * (2.0 - s * r)                 # one Newton step -> ~f32 accuracy
    return e * r


def _block_forward(x, w1, b1, g1, be1, w2, b2, g2, be2, w3, b3, real_dim):
    h = jnp.dot(x, w1, preferred_element_type=jnp.float32) + b1
    h = _batchnorm_train(h, g1, be1)
    h = jnp.dot(h, w2, preferred_element_type=jnp.float32) + b2
    h = _batchnorm_train(h, g2, be2)
    logits = jnp.dot(h, w3, preferred_element_type=jnp.float32) + b3
    return _masked_softmax(logits, real_dim)


def _generator_kernel(noise_ref,
                      uw1, ub1, ug1, ube1, uw2, ub2, ug2, ube2, uw3, ub3,
                      iw1, ib1, ig1, ibe1, iw2, ib2, ig2, ibe2, iw3, ib3,
                      user_out_ref, item_out_ref,
                      *, user_dim, item_dim):
    """Both Feature_generation_blocks fused into one kernel invocation."""
    x = noise_ref[...].astype(jnp.float32)
    user_out_ref[...] = _block_forward(
        x, uw1[...], ub1[...], ug1[...], ube1[...],
        uw2[...], ub2[...], ug2[...], ube2[...],
        uw3[...], ub3[...], user_dim).astype(user_out_ref.dtype)
    item_out_ref[...] = _block_forward(
        x, iw1[...], ib1[...], ig1[...], ibe1[...],
        iw2[...], ib2[...], ig2[...], ibe2[...],
        iw3[...], ib3[...], item_dim).astype(item_out_ref.dtype)


# ------------------------------- wrapper ----------------------------------
@jax.jit
def generator_v_forward(params, noise):
    batch = noise.shape[0]
    up, ip = params["user_data"], params["item_data"]
    user_dim = up["w3"].shape[1]
    item_dim = ip["w3"].shape[1]
    user_pad = _round_up(user_dim, LANE)
    item_pad = _round_up(item_dim, LANE)

    def pad_cols(a, width):
        return jnp.pad(a, ((0, 0), (0, width - a.shape[1])))

    args = (noise,
            up["w1"], up["b1"], up["g1"], up["be1"],
            up["w2"], up["b2"], up["g2"], up["be2"],
            pad_cols(up["w3"], user_pad), pad_cols(up["b3"], user_pad),
            ip["w1"], ip["b1"], ip["g1"], ip["be1"],
            ip["w2"], ip["b2"], ip["g2"], ip["be2"],
            pad_cols(ip["w3"], item_pad), pad_cols(ip["b3"], item_pad))

    vmem = pl.BlockSpec(memory_space=pltpu.MemorySpace.VMEM)

    flops = 2 * batch * (
        up["w1"].shape[0] * up["w1"].shape[1]
        + up["w2"].shape[0] * up["w2"].shape[1]
        + up["w3"].shape[0] * user_pad
        + ip["w1"].shape[0] * ip["w1"].shape[1]
        + ip["w2"].shape[0] * ip["w2"].shape[1]
        + ip["w3"].shape[0] * item_pad)
    bytes_accessed = 4 * (sum(a.size for a in args)
                          + batch * (user_pad + item_pad))
    transcendentals = batch * (user_pad + item_pad)      # exp in the softmaxes

    user_p, item_p = pl.pallas_call(
        functools.partial(_generator_kernel,
                          user_dim=user_dim, item_dim=item_dim),
        out_shape=(jax.ShapeDtypeStruct((batch, user_pad), jnp.float32),
                   jax.ShapeDtypeStruct((batch, item_pad), jnp.float32)),
        in_specs=[vmem] * len(args),
        out_specs=(vmem, vmem),
        cost_estimate=pl.CostEstimate(flops=flops,
                                      transcendentals=transcendentals,
                                      bytes_accessed=bytes_accessed),
    )(*args)

    return user_p[:, :user_dim], item_p[:, :item_dim]


# ----------------------------- initialization -----------------------------
def _init_linear(key, fan_in, fan_out):
    """PyTorch-style uniform(-1/sqrt(fan_in), 1/sqrt(fan_in)) init."""
    kw, kb = jax.random.split(key)
    bound = 1.0 / (fan_in ** 0.5)
    w = jax.random.uniform(kw, (fan_in, fan_out), jnp.float32, -bound, bound)
    b = jax.random.uniform(kb, (1, fan_out), jnp.float32, -bound, bound)
    return w, b


def init_fgb_params(key, input_dim, output_dim):
    dim_diff = output_dim // input_dim
    h1 = input_dim * dim_diff // 3
    h2 = h1 * 2
    k1, k2, k3 = jax.random.split(key, 3)
    w1, b1 = _init_linear(k1, input_dim, h1)
    w2, b2 = _init_linear(k2, h1, h2)
    w3, b3 = _init_linear(k3, h2, output_dim)
    return {
        "w1": w1, "b1": b1,
        "g1": jnp.ones((1, h1), jnp.float32), "be1": jnp.zeros((1, h1), jnp.float32),
        "w2": w2, "b2": b2,
        "g2": jnp.ones((1, h2), jnp.float32), "be2": jnp.zeros((1, h2), jnp.float32),
        "w3": w3, "b3": b3,
    }


def init_generator_v(key, gen_dim_user, gen_dim_item, input_dim):
    ku, ki = jax.random.split(key)
    return {
        "user_data": init_fgb_params(ku, input_dim, gen_dim_user),
        "item_data": init_fgb_params(ki, input_dim, gen_dim_item),
    }


# ---------------- pure-JAX reference (PyTorch semantics) -------------------
def _fgb_ref(noise, p):
    def bn(x, g, b):
        mean = jnp.mean(x, axis=0, keepdims=True)
        var = jnp.mean((x - mean) ** 2, axis=0, keepdims=True)
        return (x - mean) / jnp.sqrt(var + BN_EPS) * g + b
    h = noise @ p["w1"] + p["b1"]
    h = bn(h, p["g1"], p["be1"])
    h = h @ p["w2"] + p["b2"]
    h = bn(h, p["g2"], p["be2"])
    h = h @ p["w3"] + p["b3"]
    return jax.nn.softmax(h, axis=1)


if __name__ == "__main__":
    # Small shapes consistent with the module:
    #   noise: (batch=8, input_dim=32); gen_dim_user=96, gen_dim_item=192
    batch, input_dim = 8, 32
    gen_dim_user, gen_dim_item = 96, 192

    key = jax.random.PRNGKey(0)
    k_params, k_noise = jax.random.split(key)
    params = init_generator_v(k_params, gen_dim_user, gen_dim_item, input_dim)
    noise = jax.random.uniform(k_noise, (batch, input_dim), jnp.float32)

    user_feat, item_feat = generator_v_forward(params, noise)
    jax.block_until_ready((user_feat, item_feat))

    # sanity checks
    assert user_feat.shape == (batch, gen_dim_user)
    assert item_feat.shape == (batch, gen_dim_item)
    ref_u = _fgb_ref(noise, params["user_data"])
    ref_i = _fgb_ref(noise, params["item_data"])
    assert jnp.allclose(user_feat, ref_u, atol=1e-4, rtol=1e-4)
    assert jnp.allclose(item_feat, ref_i, atol=1e-4, rtol=1e-4)
    # softmax rows sum to 1
    assert jnp.allclose(jnp.sum(user_feat, axis=1), 1.0, atol=1e-4)
    assert jnp.allclose(jnp.sum(item_feat, axis=1), 1.0, atol=1e-4)

    print("KERNEL_OK")
</pallas_src>

<mosaic_0001>
module attributes {stable_mosaic.version = 11 : i64} {
  func.func @_generator_kernel(%arg0: memref<8x32xf32, #tpu.memory_space<vmem>>, %arg1: memref<32x32xf32, #tpu.memory_space<vmem>>, %arg2: memref<1x32xf32, #tpu.memory_space<vmem>>, %arg3: memref<1x32xf32, #tpu.memory_space<vmem>>, %arg4: memref<1x32xf32, #tpu.memory_space<vmem>>, %arg5: memref<32x64xf32, #tpu.memory_space<vmem>>, %arg6: memref<1x64xf32, #tpu.memory_space<vmem>>, %arg7: memref<1x64xf32, #tpu.memory_space<vmem>>, %arg8: memref<1x64xf32, #tpu.memory_space<vmem>>, %arg9: memref<64x128xf32, #tpu.memory_space<vmem>>, %arg10: memref<1x128xf32, #tpu.memory_space<vmem>>, %arg11: memref<32x64xf32, #tpu.memory_space<vmem>>, %arg12: memref<1x64xf32, #tpu.memory_space<vmem>>, %arg13: memref<1x64xf32, #tpu.memory_space<vmem>>, %arg14: memref<1x64xf32, #tpu.memory_space<vmem>>, %arg15: memref<64x128xf32, #tpu.memory_space<vmem>>, %arg16: memref<1x128xf32, #tpu.memory_space<vmem>>, %arg17: memref<1x128xf32, #tpu.memory_space<vmem>>, %arg18: memref<1x128xf32, #tpu.memory_space<vmem>>, %arg19: memref<128x256xf32, #tpu.memory_space<vmem>>, %arg20: memref<1x256xf32, #tpu.memory_space<vmem>>, %arg21: memref<8x128xf32, #tpu.memory_space<vmem>>, %arg22: memref<8x256xf32, #tpu.memory_space<vmem>>) attributes {dimension_semantics = [], scalar_prefetch = 0 : i64, scratch_operands = 0 : i64, tpu.core_type = #tpu.core_type<tc>} {
    %c0 = arith.constant 0 : index
    %c0_0 = arith.constant 0 : index
    %0 = vector.load %arg0[%c0, %c0_0] : memref<8x32xf32, #tpu.memory_space<vmem>>, vector<8x32xf32>
    %c0_1 = arith.constant 0 : index
    %c0_2 = arith.constant 0 : index
    %1 = vector.load %arg1[%c0_1, %c0_2] : memref<32x32xf32, #tpu.memory_space<vmem>>, vector<32x32xf32>
    %c0_3 = arith.constant 0 : index
    %c0_4 = arith.constant 0 : index
    %2 = vector.load %arg2[%c0_3, %c0_4] : memref<1x32xf32, #tpu.memory_space<vmem>>, vector<1x32xf32>
    %c0_5 = arith.constant 0 : index
    %c0_6 = arith.constant 0 : index
    %3 = vector.load %arg3[%c0_5, %c0_6] : memref<1x32xf32, #tpu.memory_space<vmem>>, vector<1x32xf32>
    %c0_7 = arith.constant 0 : index
    %c0_8 = arith.constant 0 : index
    %4 = vector.load %arg4[%c0_7, %c0_8] : memref<1x32xf32, #tpu.memory_space<vmem>>, vector<1x32xf32>
    %c0_9 = arith.constant 0 : index
    %c0_10 = arith.constant 0 : index
    %5 = vector.load %arg5[%c0_9, %c0_10] : memref<32x64xf32, #tpu.memory_space<vmem>>, vector<32x64xf32>
    %c0_11 = arith.constant 0 : index
    %c0_12 = arith.constant 0 : index
    %6 = vector.load %arg6[%c0_11, %c0_12] : memref<1x64xf32, #tpu.memory_space<vmem>>, vector<1x64xf32>
    %c0_13 = arith.constant 0 : index
    %c0_14 = arith.constant 0 : index
    %7 = vector.load %arg7[%c0_13, %c0_14] : memref<1x64xf32, #tpu.memory_space<vmem>>, vector<1x64xf32>
    %c0_15 = arith.constant 0 : index
    %c0_16 = arith.constant 0 : index
    %8 = vector.load %arg8[%c0_15, %c0_16] : memref<1x64xf32, #tpu.memory_space<vmem>>, vector<1x64xf32>
    %c0_17 = arith.constant 0 : index
    %c0_18 = arith.constant 0 : index
    %9 = vector.load %arg9[%c0_17, %c0_18] : memref<64x128xf32, #tpu.memory_space<vmem>>, vector<64x128xf32>
    %c0_19 = arith.constant 0 : index
    %c0_20 = arith.constant 0 : index
    %10 = vector.load %arg10[%c0_19, %c0_20] : memref<1x128xf32, #tpu.memory_space<vmem>>, vector<1x128xf32>
    %cst = arith.constant dense<0.000000e+00> : vector<8x32xf32>
    %11 = tpu.matmul %0, %1, %cst {dimension_numbers = #tpu.dot_dimension_numbers<[1], [0], [0], [1], [0, 0, 1, 1], [], []>} : vector<8x32xf32>, vector<32x32xf32>, vector<8x32xf32> -> vector<8x32xf32>
    %12 = vector.broadcast %2 : vector<1x32xf32> to vector<8x32xf32>
    %13 = arith.addf %11, %12 : vector<8x32xf32>
    %cst_21 = arith.constant dense<0.000000e+00> : vector<32xf32>
    %14 = vector.multi_reduction <add>, %13, %cst_21 [0] : vector<8x32xf32> to vector<32xf32>
    %15 = vector.shape_cast %14 : vector<32xf32> to vector<1x32xf32>
    %cst_22 = arith.constant 1.250000e-01 : f32
    %16 = vector.broadcast %cst_22 : f32 to vector<1x32xf32>
    %17 = arith.mulf %15, %16 : vector<1x32xf32>
    %18 = arith.mulf %13, %13 : vector<8x32xf32>
    %cst_23 = arith.constant dense<0.000000e+00> : vector<32xf32>
    %19 = vector.multi_reduction <add>, %18, %cst_23 [0] : vector<8x32xf32> to vector<32xf32>
    %20 = vector.shape_cast %19 : vector<32xf32> to vector<1x32xf32>
    %cst_24 = arith.constant 1.250000e-01 : f32
    %21 = vector.broadcast %cst_24 : f32 to vector<1x32xf32>
    %22 = arith.mulf %20, %21 : vector<1x32xf32>
    %23 = arith.mulf %17, %17 : vector<1x32xf32>
    %24 = arith.subf %22, %23 : vector<1x32xf32>
    %cst_25 = arith.constant 0.000000e+00 : f32
    %25 = vector.broadcast %cst_25 : f32 to vector<1x32xf32>
    %26 = arith.maximumf %24, %25 : vector<1x32xf32>
    %cst_26 = arith.constant 9.99999974E-6 : f32
    %27 = vector.broadcast %cst_26 : f32 to vector<1x32xf32>
    %28 = arith.addf %26, %27 : vector<1x32xf32>
    %29 = math.rsqrt %28 : vector<1x32xf32>
    %30 = arith.mulf %3, %29 : vector<1x32xf32>
    %31 = arith.mulf %17, %30 : vector<1x32xf32>
    %32 = arith.subf %4, %31 : vector<1x32xf32>
    %33 = vector.broadcast %30 : vector<1x32xf32> to vector<8x32xf32>
    %34 = arith.mulf %13, %33 : vector<8x32xf32>
    %35 = vector.broadcast %32 : vector<1x32xf32> to vector<8x32xf32>
    %36 = arith.addf %34, %35 : vector<8x32xf32>
    %cst_27 = arith.constant dense<0.000000e+00> : vector<8x64xf32>
    %37 = tpu.matmul %36, %5, %cst_27 {dimension_numbers = #tpu.dot_dimension_numbers<[1], [0], [0], [1], [0, 0, 1, 1], [], []>} : vector<8x32xf32>, vector<32x64xf32>, vector<8x64xf32> -> vector<8x64xf32>
    %38 = vector.broadcast %6 : vector<1x64xf32> to vector<8x64xf32>
    %39 = arith.addf %37, %38 : vector<8x64xf32>
    %cst_28 = arith.constant dense<0.000000e+00> : vector<64xf32>
    %40 = vector.multi_reduction <add>, %39, %cst_28 [0] : vector<8x64xf32> to vector<64xf32>
    %41 = vector.shape_cast %40 : vector<64xf32> to vector<1x64xf32>
    %cst_29 = arith.constant 1.250000e-01 : f32
    %42 = vector.broadcast %cst_29 : f32 to vector<1x64xf32>
    %43 = arith.mulf %41, %42 : vector<1x64xf32>
    %44 = arith.mulf %39, %39 : vector<8x64xf32>
    %cst_30 = arith.constant dense<0.000000e+00> : vector<64xf32>
    %45 = vector.multi_reduction <add>, %44, %cst_30 [0] : vector<8x64xf32> to vector<64xf32>
    %46 = vector.shape_cast %45 : vector<64xf32> to vector<1x64xf32>
    %cst_31 = arith.constant 1.250000e-01 : f32
    %47 = vector.broadcast %cst_31 : f32 to vector<1x64xf32>
    %48 = arith.mulf %46, %47 : vector<1x64xf32>
    %49 = arith.mulf %43, %43 : vector<1x64xf32>
    %50 = arith.subf %48, %49 : vector<1x64xf32>
    %cst_32 = arith.constant 0.000000e+00 : f32
    %51 = vector.broadcast %cst_32 : f32 to vector<1x64xf32>
    %52 = arith.maximumf %50, %51 : vector<1x64xf32>
    %cst_33 = arith.constant 9.99999974E-6 : f32
    %53 = vector.broadcast %cst_33 : f32 to vector<1x64xf32>
    %54 = arith.addf %52, %53 : vector<1x64xf32>
    %55 = math.rsqrt %54 : vector<1x64xf32>
    %56 = arith.mulf %7, %55 : vector<1x64xf32>
    %57 = arith.mulf %43, %56 : vector<1x64xf32>
    %58 = arith.subf %8, %57 : vector<1x64xf32>
    %59 = vector.broadcast %56 : vector<1x64xf32> to vector<8x64xf32>
    %60 = arith.mulf %39, %59 : vector<8x64xf32>
    %61 = vector.broadcast %58 : vector<1x64xf32> to vector<8x64xf32>
    %62 = arith.addf %60, %61 : vector<8x64xf32>
    %cst_34 = arith.constant dense<0.000000e+00> : vector<8x128xf32>
    %63 = tpu.matmul %62, %9, %cst_34 {dimension_numbers = #tpu.dot_dimension_numbers<[1], [0], [0], [1], [0, 0, 1, 1], [], []>} : vector<8x64xf32>, vector<64x128xf32>, vector<8x128xf32> -> vector<8x128xf32>
    %64 = vector.broadcast %10 : vector<1x128xf32> to vector<8x128xf32>
    %65 = arith.addf %63, %64 : vector<8x128xf32>
    %66 = tpu.iota {dimensions = array<i32: 1>} : vector<8x128xi32>
    %c96_i32 = arith.constant 96 : i32
    %67 = vector.broadcast %c96_i32 : i32 to vector<8x128xi32>
    %68 = arith.cmpi slt, %66, %67 : vector<8x128xi32>
    %cst_35 = arith.constant 0xFF800000 : f32
    %69 = vector.broadcast %cst_35 : f32 to vector<8x128xf32>
    %70 = arith.select %68, %65, %69 : vector<8x128xi1>, vector<8x128xf32>
    %cst_36 = arith.constant dense<0xFF800000> : vector<8xf32>
    %71 = vector.multi_reduction <maximumf>, %70, %cst_36 [1] : vector<8x128xf32> to vector<8xf32>
    %72 = vector.shape_cast %71 : vector<8xf32> to vector<8x1xf32>
    %73 = vector.broadcast %72 : vector<8x1xf32> to vector<8x128xf32>
    %74 = arith.subf %65, %73 : vector<8x128xf32>
    %75 = math.exp %74 : vector<8x128xf32>
    %cst_37 = arith.constant 0.000000e+00 : f32
    %76 = vector.broadcast %cst_37 : f32 to vector<8x128xf32>
    %77 = arith.select %68, %75, %76 : vector<8x128xi1>, vector<8x128xf32>
    %cst_38 = arith.constant dense<0.000000e+00> : vector<8xf32>
    %78 = vector.multi_reduction <add>, %77, %cst_38 [1] : vector<8x128xf32> to vector<8xf32>
    %79 = vector.shape_cast %78 : vector<8xf32> to vector<8x1xf32>
    %80 = tpu.reciprocal %79 {approx = true} : vector<8x1xf32> -> vector<8x1xf32>
    %81 = arith.mulf %79, %80 : vector<8x1xf32>
    %cst_39 = arith.constant 2.000000e+00 : f32
    %82 = vector.broadcast %cst_39 : f32 to vector<8x1xf32>
    %83 = arith.subf %82, %81 : vector<8x1xf32>
    %84 = arith.mulf %80, %83 : vector<8x1xf32>
    %85 = vector.broadcast %84 : vector<8x1xf32> to vector<8x128xf32>
    %86 = arith.mulf %77, %85 : vector<8x128xf32>
    %c0_40 = arith.constant 0 : index
    %c0_41 = arith.constant 0 : index
    %87 = vector.load %arg21[%c0_40, %c0_41] : memref<8x128xf32, #tpu.memory_space<vmem>>, vector<8x128xf32>
    tpu.vector_store %arg21[%c0_40, %c0_41], %86 {strides = array<i32>} : memref<8x128xf32, #tpu.memory_space<vmem>>, vector<8x128xf32>,
    %c0_42 = arith.constant 0 : index
    %c0_43 = arith.constant 0 : index
    %88 = vector.load %arg11[%c0_42, %c0_43] : memref<32x64xf32, #tpu.memory_space<vmem>>, vector<32x64xf32>
    %c0_44 = arith.constant 0 : index
    %c0_45 = arith.constant 0 : index
    %89 = vector.load %arg12[%c0_44, %c0_45] : memref<1x64xf32, #tpu.memory_space<vmem>>, vector<1x64xf32>
    %c0_46 = arith.constant 0 : index
    %c0_47 = arith.constant 0 : index
    %90 = vector.load %arg13[%c0_46, %c0_47] : memref<1x64xf32, #tpu.memory_space<vmem>>, vector<1x64xf32>
    %c0_48 = arith.constant 0 : index
    %c0_49 = arith.constant 0 : index
    %91 = vector.load %arg14[%c0_48, %c0_49] : memref<1x64xf32, #tpu.memory_space<vmem>>, vector<1x64xf32>
    %c0_50 = arith.constant 0 : index
    %c0_51 = arith.constant 0 : index
    %92 = vector.load %arg15[%c0_50, %c0_51] : memref<64x128xf32, #tpu.memory_space<vmem>>, vector<64x128xf32>
    %c0_52 = arith.constant 0 : index
    %c0_53 = arith.constant 0 : index
    %93 = vector.load %arg16[%c0_52, %c0_53] : memref<1x128xf32, #tpu.memory_space<vmem>>, vector<1x128xf32>
    %c0_54 = arith.constant 0 : index
    %c0_55 = arith.constant 0 : index
    %94 = vector.load %arg17[%c0_54, %c0_55] : memref<1x128xf32, #tpu.memory_space<vmem>>, vector<1x128xf32>
    %c0_56 = arith.constant 0 : index
    %c0_57 = arith.constant 0 : index
    %95 = vector.load %arg18[%c0_56, %c0_57] : memref<1x128xf32, #tpu.memory_space<vmem>>, vector<1x128xf32>
    %c0_58 = arith.constant 0 : index
    %c0_59 = arith.constant 0 : index
    %96 = vector.load %arg19[%c0_58, %c0_59] : memref<128x256xf32, #tpu.memory_space<vmem>>, vector<128x256xf32>
    %c0_60 = arith.constant 0 : index
    %c0_61 = arith.constant 0 : index
    %97 = vector.load %arg20[%c0_60, %c0_61] : memref<1x256xf32, #tpu.memory_space<vmem>>, vector<1x256xf32>
    %cst_62 = arith.constant dense<0.000000e+00> : vector<8x64xf32>
    %98 = tpu.matmul %0, %88, %cst_62 {dimension_numbers = #tpu.dot_dimension_numbers<[1], [0], [0], [1], [0, 0, 1, 1], [], []>} : vector<8x32xf32>, vector<32x64xf32>, vector<8x64xf32> -> vector<8x64xf32>
    %99 = vector.broadcast %89 : vector<1x64xf32> to vector<8x64xf32>
    %100 = arith.addf %98, %99 : vector<8x64xf32>
    %cst_63 = arith.constant dense<0.000000e+00> : vector<64xf32>
    %101 = vector.multi_reduction <add>, %100, %cst_63 [0] : vector<8x64xf32> to vector<64xf32>
    %102 = vector.shape_cast %101 : vector<64xf32> to vector<1x64xf32>
    %cst_64 = arith.constant 1.250000e-01 : f32
    %103 = vector.broadcast %cst_64 : f32 to vector<1x64xf32>
    %104 = arith.mulf %102, %103 : vector<1x64xf32>
    %105 = arith.mulf %100, %100 : vector<8x64xf32>
    %cst_65 = arith.constant dense<0.000000e+00> : vector<64xf32>
    %106 = vector.multi_reduction <add>, %105, %cst_65 [0] : vector<8x64xf32> to vector<64xf32>
    %107 = vector.shape_cast %106 : vector<64xf32> to vector<1x64xf32>
    %cst_66 = arith.constant 1.250000e-01 : f32
    %108 = vector.broadcast %cst_66 : f32 to vector<1x64xf32>
    %109 = arith.mulf %107, %108 : vector<1x64xf32>
    %110 = arith.mulf %104, %104 : vector<1x64xf32>
    %111 = arith.subf %109, %110 : vector<1x64xf32>
    %cst_67 = arith.constant 0.000000e+00 : f32
    %112 = vector.broadcast %cst_67 : f32 to vector<1x64xf32>
    %113 = arith.maximumf %111, %112 : vector<1x64xf32>
    %cst_68 = arith.constant 9.99999974E-6 : f32
    %114 = vector.broadcast %cst_68 : f32 to vector<1x64xf32>
    %115 = arith.addf %113, %114 : vector<1x64xf32>
    %116 = math.rsqrt %115 : vector<1x64xf32>
    %117 = arith.mulf %90, %116 : vector<1x64xf32>
    %118 = arith.mulf %104, %117 : vector<1x64xf32>
    %119 = arith.subf %91, %118 : vector<1x64xf32>
    %120 = vector.broadcast %117 : vector<1x64xf32> to vector<8x64xf32>
    %121 = arith.mulf %100, %120 : vector<8x64xf32>
    %122 = vector.broadcast %119 : vector<1x64xf32> to vector<8x64xf32>
    %123 = arith.addf %121, %122 : vector<8x64xf32>
    %cst_69 = arith.constant dense<0.000000e+00> : vector<8x128xf32>
    %124 = tpu.matmul %123, %92, %cst_69 {dimension_numbers = #tpu.dot_dimension_numbers<[1], [0], [0], [1], [0, 0, 1, 1], [], []>} : vector<8x64xf32>, vector<64x128xf32>, vector<8x128xf32> -> vector<8x128xf32>
    %125 = vector.broadcast %93 : vector<1x128xf32> to vector<8x128xf32>
    %126 = arith.addf %124, %125 : vector<8x128xf32>
    %cst_70 = arith.constant dense<0.000000e+00> : vector<128xf32>
    %127 = vector.multi_reduction <add>, %126, %cst_70 [0] : vector<8x128xf32> to vector<128xf32>
    %128 = vector.shape_cast %127 : vector<128xf32> to vector<1x128xf32>
    %cst_71 = arith.constant 1.250000e-01 : f32
    %129 = vector.broadcast %cst_71 : f32 to vector<1x128xf32>
    %130 = arith.mulf %128, %129 : vector<1x128xf32>
    %131 = arith.mulf %126, %126 : vector<8x128xf32>
    %cst_72 = arith.constant dense<0.000000e+00> : vector<128xf32>
    %132 = vector.multi_reduction <add>, %131, %cst_72 [0] : vector<8x128xf32> to vector<128xf32>
    %133 = vector.shape_cast %132 : vector<128xf32> to vector<1x128xf32>
    %cst_73 = arith.constant 1.250000e-01 : f32
    %134 = vector.broadcast %cst_73 : f32 to vector<1x128xf32>
    %135 = arith.mulf %133, %134 : vector<1x128xf32>
    %136 = arith.mulf %130, %130 : vector<1x128xf32>
    %137 = arith.subf %135, %136 : vector<1x128xf32>
    %cst_74 = arith.constant 0.000000e+00 : f32
    %138 = vector.broadcast %cst_74 : f32 to vector<1x128xf32>
    %139 = arith.maximumf %137, %138 : vector<1x128xf32>
    %cst_75 = arith.constant 9.99999974E-6 : f32
    %140 = vector.broadcast %cst_75 : f32 to vector<1x128xf32>
    %141 = arith.addf %139, %140 : vector<1x128xf32>
    %142 = math.rsqrt %141 : vector<1x128xf32>
    %143 = arith.mulf %94, %142 : vector<1x128xf32>
    %144 = arith.mulf %130, %143 : vector<1x128xf32>
    %145 = arith.subf %95, %144 : vector<1x128xf32>
    %146 = vector.broadcast %143 : vector<1x128xf32> to vector<8x128xf32>
    %147 = arith.mulf %126, %146 : vector<8x128xf32>
    %148 = vector.broadcast %145 : vector<1x128xf32> to vector<8x128xf32>
    %149 = arith.addf %147, %148 : vector<8x128xf32>
    %cst_76 = arith.constant dense<0.000000e+00> : vector<8x256xf32>
    %150 = tpu.matmul %149, %96, %cst_76 {dimension_numbers = #tpu.dot_dimension_numbers<[1], [0], [0], [1], [0, 0, 1, 1], [], []>} : vector<8x128xf32>, vector<128x256xf32>, vector<8x256xf32> -> vector<8x256xf32>
    %151 = vector.broadcast %97 : vector<1x256xf32> to vector<8x256xf32>
    %152 = arith.addf %150, %151 : vector<8x256xf32>
    %153 = tpu.iota {dimensions = array<i32: 1>} : vector<8x256xi32>
    %c192_i32 = arith.constant 192 : i32
    %154 = vector.broadcast %c192_i32 : i32 to vector<8x256xi32>
    %155 = arith.cmpi slt, %153, %154 : vector<8x256xi32>
    %cst_77 = arith.constant 0xFF800000 : f32
    %156 = vector.broadcast %cst_77 : f32 to vector<8x256xf32>
    %157 = arith.select %155, %152, %156 : vector<8x256xi1>, vector<8x256xf32>
    %cst_78 = arith.constant dense<0xFF800000> : vector<8xf32>
    %158 = vector.multi_reduction <maximumf>, %157, %cst_78 [1] : vector<8x256xf32> to vector<8xf32>
    %159 = vector.shape_cast %158 : vector<8xf32> to vector<8x1xf32>
    %160 = vector.broadcast %159 : vector<8x1xf32> to vector<8x256xf32>
    %161 = arith.subf %152, %160 : vector<8x256xf32>
    %162 = math.exp %161 : vector<8x256xf32>
    %cst_79 = arith.constant 0.000000e+00 : f32
    %163 = vector.broadcast %cst_79 : f32 to vector<8x256xf32>
    %164 = arith.select %155, %162, %163 : vector<8x256xi1>, vector<8x256xf32>
    %cst_80 = arith.constant dense<0.000000e+00> : vector<8xf32>
    %165 = vector.multi_reduction <add>, %164, %cst_80 [1] : vector<8x256xf32> to vector<8xf32>
    %166 = vector.shape_cast %165 : vector<8xf32> to vector<8x1xf32>
    %167 = tpu.reciprocal %166 {approx = true} : vector<8x1xf32> -> vector<8x1xf32>
    %168 = arith.mulf %166, %167 : vector<8x1xf32>
    %cst_81 = arith.constant 2.000000e+00 : f32
    %169 = vector.broadcast %cst_81 : f32 to vector<8x1xf32>
    %170 = arith.subf %169, %168 : vector<8x1xf32>
    %171 = arith.mulf %167, %170 : vector<8x1xf32>
    %172 = vector.broadcast %171 : vector<8x1xf32> to vector<8x256xf32>
    %173 = arith.mulf %164, %172 : vector<8x256xf32>
    %c0_82 = arith.constant 0 : index
    %c0_83 = arith.constant 0 : index
    %174 = vector.load %arg22[%c0_82, %c0_83] : memref<8x256xf32, #tpu.memory_space<vmem>>, vector<8x256xf32>
    tpu.vector_store %arg22[%c0_82, %c0_83], %173 {strides = array<i32>} : memref<8x256xf32, #tpu.memory_space<vmem>>, vector<8x256xf32>,
    return
  }
}

</mosaic_0001>

<bundles_post_ra>
// kernel: generator_v_forward.1
= control target key start
LH: loop header
LB: loop body
LE: loop exit
PB: predicated region body
PF: predicated region fallthrough
CT: control target
= control target key end

     0   :  { %s1539_s0 = inlined_call_operand.vmem [shape: f32[8,32], index: 0, kind: input, shape index: {}]   ;;  %s1540_s1 = inlined_call_operand.vmem [shape: f32[32,32], index: 1, kind: input, shape index: {}]   ;;  %s1541_s2 = inlined_call_operand.vmem [shape: f32[1,32], index: 2, kind: input, shape index: {}]   ;;  %s1542_s3 = inlined_call_operand.vmem [shape: f32[1,32], index: 3, kind: input, shape index: {}]   ;;  %s1543_s4 = inlined_call_operand.vmem [shape: f32[1,32], index: 4, kind: input, shape index: {}]   ;;  %s1544_s5 = inlined_call_operand.vmem [shape: f32[32,64], index: 5, kind: input, shape index: {}]   ;;  %s1545_s6 = inlined_call_operand.vmem [shape: f32[1,64], index: 6, kind: input, shape index: {}]   ;;  %s1546_s7 = inlined_call_operand.vmem [shape: f32[1,64], index: 7, kind: input, shape index: {}]   ;;  %s1547_s8 = inlined_call_operand.vmem [shape: f32[1,64], index: 8, kind: input, shape index: {}]   ;;  %s1548_s9 = inlined_call_operand.vmem [shape: f32[64,128], index: 9, kind: input, shape index: {}]   ;;  %s1549_s10 = inlined_call_operand.vmem [shape: f32[1,128], index: 10, kind: input, shape index: {}]   ;;  %s1550_s11 = inlined_call_operand.vmem [shape: f32[32,64], index: 11, kind: input, shape index: {}]   ;;  %s1551_s12 = inlined_call_operand.vmem [shape: f32[1,64], index: 12, kind: input, shape index: {}]   ;;  %s1552_s13 = inlined_call_operand.vmem [shape: f32[1,64], index: 13, kind: input, shape index: {}]   ;;  %s1553_s14 = inlined_call_operand.vmem [shape: f32[1,64], index: 14, kind: input, shape index: {}]   ;;  %s1554_s15 = inlined_call_operand.vmem [shape: f32[64,128], index: 15, kind: input, shape index: {}]   ;;  %s1555_s16 = inlined_call_operand.vmem [shape: f32[1,128], index: 16, kind: input, shape index: {}]   ;;  %s1556_s17 = inlined_call_operand.vmem [shape: f32[1,128], index: 17, kind: input, shape index: {}]   ;;  %s1557_s18 = inlined_call_operand.vmem [shape: f32[1,128], index: 18, kind: input, shape index: {}]   ;;  %s1558_s19 = inlined_call_operand.vmem [shape: f32[128,256], index: 19, kind: input, shape index: {}]   ;;  %s1559_s20 = inlined_call_operand.vmem [shape: f32[1,256], index: 20, kind: input, shape index: {}]   ;;  %s1560_s21 = inlined_call_operand.hbm [shape: f32[8,128], index: 21, kind: output, shape index: {0}]   ;;  %s1561_s22 = inlined_call_operand.hbm [shape: f32[8,256], index: 22, kind: output, shape index: {1}]  }
   0x1   :  { %1564 = sst [smem:[#allocation8_spill]] %s1539_s0 }
   0x2   :  { %1565 = sst [smem:[#allocation9_spill]] %s1540_s1 }
   0x3   :  { %1566 = sst [smem:[#allocation10_spill]] %s1541_s2 }
   0x4   :  { %1567 = sst [smem:[#allocation11_spill]] %s1542_s3 }
   0x5   :  { %1568 = sst [smem:[#allocation12_spill]] %s1543_s4 }
   0x6   :  { %1569 = sst [smem:[#allocation13_spill]] %s1544_s5 }
   0x7   :  { %1570 = sst [smem:[#allocation14_spill]] %s1545_s6 }
   0x8   :  { %28 = vsyncpa [#allocation3], 0  ;;  %s1571_s29 = sld [smem:[#allocation9_spill]]  ;;  %v1109_v3 = vmov 0.0|0.0   ;;  %vm1110_vm0 = vmmov 0   ;;  %v1111_v6 = vmov 0.0  }
   0x9   :  { %964 = vmatprep.subr.bf16.mxu1 %v1109_v3  ;;  %901 = vmatprep.mubr.msk.f32.mxu1 %vm1110_vm0, %v1111_v6 }
   0xa   :  { %976 = vmatprep.subr.bf16.mxu0 %v1109_v3  ;;  %931 = vmatprep.mubr.msk.f32.mxu0 %vm1110_vm0, %v1111_v6 }
   0xe   :  { %v73_v0 = vld [vmem:[%s1571_s29] sm:$0xff]  ;;  %v74_v1 = vld [vmem:[%s1571_s29 + $0x8] sm:$0xff]  ;;  %v75_v2 = vld [vmem:[%s1571_s29 + $0x10] sm:$0xff] }
   0xf   :  { %v965_v4 = vpack.c.bf16 %v74_v1, %v73_v0  ;;  %v76_v5 = vld [vmem:[%s1571_s29 + $0x18] sm:$0xff] }
  0x10   :  { %29 = vsyncpa [#allocation5], 0  ;;  %v968_v7 = vpack.c.bf16 %v76_v5, %v75_v2  ;;  %s1572_s25 = sld [smem:[#allocation8_spill]]  ;;  %vm102_vm1 = vcmask 261120   ;;  %s1573_s27 = sld [smem:[#allocation13_spill]]  ;;  %v202_v40 = vlaneseq  ;;  %v431_v50 = vld [vmem:[%s1550_s11] sm:$0xff] }
  0x11   :  { %966 = vmatpush3.bf16.msra.mxu1 %v965_v4  ;;  %s1574_s5 = sld [smem:[#allocation10_spill]]  ;;  %v432_v51 = vld [vmem:[%s1550_s11 + $0x8] sm:$0xff]  ;;  %v433_v56 = vld [vmem:[%s1550_s11 + $0x10] sm:$0xff]  ;;  %v434_v57 = vld [vmem:[%s1550_s11 + $0x18] sm:$0xff]  ;;  %s1577_s11 = sld [smem:[#allocation14_spill]]  ;;  %vm294_vm2 = vcmask 523264  }
  0x12   :  { %967 = vmatprep.subr.bf16.mxu1 %v1109_v3  ;;  %v1278_v41 = vshrl.u32 %v202_v40, 7  ;;  %v989_v54 = vpack.c.bf16 %v432_v51, %v431_v50  ;;  %v992_v58 = vpack.c.bf16 %v434_v57, %v433_v56  ;;  %v87_v59 = vld [vmem:[%s1548_s9] sm:$0xff]  ;;  %v88_v60 = vld [vmem:[%s1548_s9 + $0x8] sm:$0xff]  ;;  %v89_v62 = vld [vmem:[%s1548_s9 + $0x10] sm:$0xff] }
  0x13   :  { %v977_v61 = vpack.c.bf16 %v88_v60, %v87_v59  ;;  %v90_v63 = vld [vmem:[%s1548_s9 + $0x18] sm:$0xff]  ;;  %v438_v1 = vld [vmem:[%s1554_s15] sm:$0xff]  ;;  %v439_v2 = vld [vmem:[%s1554_s15 + $0x8] sm:$0xff] }
  0x14   :  { %v1284_v43 = vsub.s32 0, %v1278_v41  ;;  %v980_v0 = vpack.c.bf16 %v90_v63, %v89_v62  ;;  %v995_v4 = vpack.c.bf16 %v439_v2, %v438_v1  ;;  %v91_v5 = vld [vmem:[%s1548_s9 + $0x20] sm:$0xff] }
  0x15   :  { %969 = vmatpush3.bf16.msra.mxu1 %v968_v7  ;;  %978 = vmatpush3.bf16.msra.mxu0 %v977_v61  ;;  %v92_v7 = vld [vmem:[%s1548_s9 + $0x28] sm:$0xff] }
  0x16   :  { %v1251_v8 = vld [vmem:[%s1572_s25] sm:$0xff]  ;;  %970 = vmatprep.subr.bf16.mxu1 %v1109_v3  ;;  %v81_v10 = vld [vmem:[%s1573_s27 + $0x8] sm:$0xff]  ;;  %v82_v12 = vld [vmem:[%s1573_s27 + $0x10] sm:$0xff]  ;;  %s1575_s25 = sld [smem:[#allocation11_spill]]  ;;  %979 = vmatprep.subr.bf16.mxu0 %v1109_v3 }
  0x17   :  { %v80_v9 = vld [vmem:[%s1573_s27] sm:$0xff]  ;;  %v83_v13 = vld [vmem:[%s1573_s27 + $0x18] sm:$0xff]  ;;  %s1576_s27 = sld [smem:[#allocation12_spill]] }
  0x18   :  { %902 = vmatmul.mubr.msk.f32.vlgmr.msra.gmra.mrb[0].mxu1 %vm102_vm1, %v1251_v8  ;;  %v971_v11 = vpack.c.bf16 %v81_v10, %v80_v9  ;;  %v974_v14 = vpack.c.bf16 %v83_v13, %v82_v12  ;;  %v850_v15 = vld [vmem:[%s1574_s5] ss:$0 sm:$0xff]  ;;  %v440_v9 = vld [vmem:[%s1554_s15 + $0x10] sm:$0xff]  ;;  %v441_v10 = vld [vmem:[%s1554_s15 + $0x18] sm:$0xff] }
  0x19   :  { %912 = vmatprep.mubr.msk.f32.mxu1 %vm1110_vm0, %v1111_v6  ;;  %981 = vmatpush3.bf16.msra.mxu0 %v980_v0  ;;  %v93_v12 = vld [vmem:[%s1548_s9 + $0x30] sm:$0xff]  ;;  %v94_v13 = vld [vmem:[%s1548_s9 + $0x38] sm:$0xff] }
  0x1a   :  { %972 = vmatpush3.bf16.msra.mxu1 %v971_v11  ;;  %982 = vmatprep.subr.bf16.mxu0 %v1109_v3  ;;  %v998_v11 = vpack.c.bf16 %v441_v10, %v440_v9 }
  0x1b   :  { %973 = vmatprep.subr.bf16.mxu1 %v1109_v3 }
  0x1c   :  { %v78_v42 = vld [vmem:[%s1575_s25] sm:$0x1] }
  0x1d   :  { %v79_v46 = vld [vmem:[%s1576_s27] sm:$0x1] }
  0x1e   :  { %975 = vmatpush3.bf16.msra.mxu1 %v974_v14  ;;  %v986_v14 = vpack.c.bf16 %v94_v13, %v93_v12 }
  0x1f   :  { %988 = vmatprep.subr.bf16.mxu1 %v1109_v3 }
  0xeb   :  { %v172_v16 = vpop.f32.mrb[0].mxu1 }
  0xec   :  { %v173_v17 = vadd.f32 %v850_v15, %v172_v16  ;;  %v903_v18 = vpop.f32.mrb[1].mxu1  ;;  %v442_v15 = vld [vmem:[%s1554_s15 + $0x20] sm:$0xff]  ;;  %v443_v16 = vld [vmem:[%s1554_s15 + $0x28] sm:$0xff] }
  0xed   :  { %v444_v18 = vld [vmem:[%s1554_s15 + $0x30] sm:$0xff] }
  0xee   :  { %v176_v19 = vsel %vm102_vm1, %v173_v17, 0.0  ;;  %v184_v20 = vmul.f32 %v173_v17, %v173_v17 }
  0xef   :  { %v177_v21 = vrot.slane %v176_v19, 4 }
  0xf0   :  { %v185_v22 = vsel %vm102_vm1, %v184_v20, 0.0 }
  0xf1   :  { %v178_v23 = vadd.f32 %v177_v21, %v176_v19  ;;  %v186_v24 = vrot.slane %v185_v22, 4  ;;  %v445_v19 = vld [vmem:[%s1554_s15 + $0x38] sm:$0xff]  ;;  %v852_v21 = vld [vmem:[%s1577_s11] ss:$0 sm:$0xff] }
  0xf2   :  { %v1004_v20 = vpack.c.bf16 %v445_v19, %v444_v18  ;;  %v436_v18 = vld [vmem:[%s1552_s13] sm:$0x1]  ;;  %s1113_s13 = smov [#allocation4]  }
  0xf3   :  { %v179_v25 = vrot.slane %v178_v23, 2  ;;  %v187_v26 = vadd.f32 %v186_v24, %v185_v22  ;;  %s838_s28 = sshll.u32 %s1113_s13, 4  ;;  %s839_s28 = int_to_ptr.vmem [resolvable:$true] %s838_s28 }
  0xf5   :  { %v180_v27 = vadd.f32 %v179_v25, %v178_v23  ;;  %v188_v28 = vrot.slane %v187_v26, 2 }
  0xf7   :  { %v181_v29 = vrot.slane %v180_v27, 1  ;;  %v189_v30 = vadd.f32 %v188_v28, %v187_v26 }
  0xf9   :  { %v182_v31 = vadd.f32 %v181_v29, %v180_v27  ;;  %v190_v32 = vrot.slane %v189_v30, 1 }
  0xfb   :  { %v183_v33 = vmul.f32 0.125, %v182_v31  ;;  %v191_v34 = vadd.f32 %v190_v32, %v189_v30  ;;  %v856_v30 = vld [vmem:[%s1551_s12] ss:$0 sm:$0xff] }
  0xfd   :  { %v192_v35 = vmul.f32 0.125, %v191_v34  ;;  %v193_v36 = vmul.f32 %v183_v33, %v183_v33 }
  0xff   :  { %v194_v37 = vsub.f32 %v192_v35, %v193_v36 }
 0x101   :  { %v195_v38 = vmax.f32 %v194_v37, 0.0 }
 0x103   :  { %v196_v39 = vadd.f32 1e-05, %v195_v38 }
 0x105   :  { %1043 = vrsqrt.f32 %v196_v39 }
 0x10f   :  { %v1044_v44 = vpop.eup %1043 }
 0x110   :  { %v198_v45 = vmul.f32 %v1044_v44, %v78_v42 }
 0x112   :  { %v199_v47 = vmul.f32 %v198_v45, %v183_v33  ;;  %v205_v48 = vrot.slane %v198_v45, %v1284_v43 }
 0x114   :  { %v200_v49 = vsub.f32 %v79_v46, %v199_v47  ;;  %v207_v52 = vmul.f32 %v205_v48, %v173_v17  ;;  %v1001_v17 = vpack.c.bf16 %v443_v16, %v442_v15 }
 0x116   :  { %v212_v53 = vrot.slane %v200_v49, %v1284_v43 }
 0x118   :  { %v214_v55 = vadd.f32 %v212_v53, %v207_v52 }
 0x11a   :  { %913 = vmatmul.mubr.msk.f32.vlgmr.msra.gmra.mrb[2].mxu1 %vm102_vm1, %v214_v55 }
 0x11b   :  { %990 = vmatpush3.bf16.msra.mxu1 %v989_v54  ;;  %942 = vmatprep.mubr.msk.f32.mxu1 %vm1110_vm0, %v1111_v6 }
 0x11c   :  { %991 = vmatprep.subr.bf16.mxu1 %v1109_v3 }
 0x11f   :  { %993 = vmatpush3.bf16.msra.mxu1 %v992_v58 }
 0x120   :  { %994 = vmatprep.subr.bf16.mxu1 %v1109_v3 }
 0x122   :  { %943 = vmatmul.mubr.msk.f32.vlgmr.msra.gmra.mrb[4].mxu1 %vm102_vm1, %v1251_v8  ;;  %v983_v8 = vpack.c.bf16 %v92_v7, %v91_v5 }
 0x123   :  { %961 = vmatprep.mubr.msk.f32.mxu1 %vm1110_vm0, %v1111_v6  ;;  %996 = vmatpush3.bf16.msra.mxu1 %v995_v4 }
 0x124   :  { %984 = vmatpush3.bf16.msra.mxu0 %v983_v8  ;;  %997 = vmatprep.subr.bf16.mxu1 %v1109_v3 }
 0x125   :  { %985 = vmatprep.subr.bf16.mxu0 %v1109_v3 }
 0x127   :  { %999 = vmatpush3.bf16.msra.mxu1 %v998_v11  ;;  %v85_v11 = vld [vmem:[%s1546_s7] sm:$0x1] }
 0x128   :  { %987 = vmatpush3.bf16.msra.mxu0 %v986_v14  ;;  %1000 = vmatprep.subr.bf16.mxu1 %v1109_v3  ;;  %v86_v14 = vld [vmem:[%s1547_s8] sm:$0x1] }
 0x12b   :  { %1002 = vmatpush3.bf16.msra.mxu1 %v1001_v17 }
 0x12c   :  { %1003 = vmatprep.subr.bf16.mxu1 %v1109_v3 }
 0x12f   :  { %1005 = vmatpush3.bf16.msra.mxu1 %v1004_v20 }
 0x1ed   :  { %v290_v22 = vpop.f32.mrb[2].mxu1 }
 0x1ee   :  { %v291_v23 = vadd.f32 %v852_v21, %v290_v22  ;;  %v914_v24 = vpop.f32.mrb[3].mxu1 }
 0x1f0   :  { %v295_v3 = vsel %vm294_vm2, %v291_v23, 0.0  ;;  %v303_v25 = vmul.f32 %v291_v23, %v291_v23 }
 0x1f1   :  { %v296_v26 = vrot.slane %v295_v3, 4 }
 0x1f2   :  { %v304_v27 = vsel %vm294_vm2, %v303_v25, 0.0 }
 0x1f3   :  { %v297_v28 = vadd.f32 %v296_v26, %v295_v3  ;;  %v305_v29 = vrot.slane %v304_v27, 4  ;;  %v437_v3 = vld [vmem:[%s1553_s14] sm:$0x1] }
 0x1f5   :  { %v298_v31 = vrot.slane %v297_v28, 2  ;;  %v306_v32 = vadd.f32 %v305_v29, %v304_v27  ;;  %v554_v33 = vpop.f32.mrb[4].mxu1 }
 0x1f6   :  { %v555_v34 = vadd.f32 %v856_v30, %v554_v33  ;;  %v944_v35 = vpop.f32.mrb[5].mxu1  ;;  %v450_v30 = vld [vmem:[%s1558_s19 + $0x8] sm:$0xff]  ;;  %v451_v33 = vld [vmem:[%s1558_s19 + $0x10] sm:$0xff] }
 0x1f7   :  { %v299_v36 = vadd.f32 %v298_v31, %v297_v28  ;;  %v307_v37 = vrot.slane %v306_v32, 2  ;;  %v452_v31 = vld [vmem:[%s1558_s19 + $0x18] sm:$0xff]  ;;  %v454_v35 = vld [vmem:[%s1558_s19 + $0x28] sm:$0xff] }
 0x1f8   :  { %v558_v38 = vsel %vm294_vm2, %v555_v34, 0.0  ;;  %v566_v39 = vmul.f32 %v555_v34, %v555_v34 }
 0x1f9   :  { %v300_v42 = vrot.slane %v299_v36, 1  ;;  %v308_v44 = vadd.f32 %v307_v37, %v306_v32  ;;  %v559_v45 = vrot.slane %v558_v38, 4  ;;  %v1006_v32 = vpack.c.bf16 %v452_v31, %v450_v30 }
 0x1fa   :  { %v567_v46 = vsel %vm294_vm2, %v566_v39, 0.0  ;;  %v455_v39 = vld [vmem:[%s1558_s19 + $0x30] sm:$0xff] }
 0x1fb   :  { %v301_v47 = vadd.f32 %v300_v42, %v299_v36  ;;  %v309_v48 = vrot.slane %v308_v44, 1  ;;  %v560_v49 = vadd.f32 %v559_v45, %v558_v38  ;;  %v568_v50 = vrot.slane %v567_v46, 4  ;;  %1007 = vmatprep.subr.bf16.mxu0 %v1006_v32  ;;  %v456_v36 = vld [vmem:[%s1558_s19 + $0x38] sm:$0xff]  ;;  %v453_v38 = vld [vmem:[%s1558_s19 + $0x20] sm:$0xff] }
 0x1fc   :  { %v1010_v37 = vpack.c.bf16 %v456_v36, %v454_v35  ;;  %v1012_v42 = vpack.c.bf16 %v455_v39, %v453_v38  ;;  %v460_v45 = vld [vmem:[%s1558_s19 + $0x58] sm:$0xff] }
 0x1fd   :  { %v302_v51 = vmul.f32 0.125, %v301_v47  ;;  %v310_v52 = vadd.f32 %v309_v48, %v308_v44  ;;  %v561_v53 = vrot.slane %v560_v49, 2  ;;  %v569_v54 = vadd.f32 %v568_v50, %v567_v46  ;;  %v458_v44 = vld [vmem:[%s1558_s19 + $0x48] sm:$0xff]  ;;  %v457_v47 = vld [vmem:[%s1558_s19 + $0x40] sm:$0xff]  ;;  %v459_v48 = vld [vmem:[%s1558_s19 + $0x50] sm:$0xff] }
 0x1fe   :  { %v1014_v46 = vpack.c.bf16 %v460_v45, %v458_v44  ;;  %v462_v50 = vld [vmem:[%s1558_s19 + $0x68] sm:$0xff]  ;;  %v447_v44 = vld [vmem:[%s1556_s17] sm:$0x1] }
 0x1ff   :  { %v311_v55 = vmul.f32 0.125, %v310_v52  ;;  %v312_v56 = vmul.f32 %v302_v51, %v302_v51  ;;  %v562_v57 = vadd.f32 %v561_v53, %v560_v49  ;;  %v570_v58 = vrot.slane %v569_v54, 2  ;;  %v461_v53 = vld [vmem:[%s1558_s19 + $0x60] sm:$0xff] }
 0x200   :  { %v1016_v49 = vpack.c.bf16 %v459_v48, %v457_v47  ;;  %v448_v47 = vld [vmem:[%s1557_s18] sm:$0x1] }
 0x201   :  { %v313_v59 = vsub.f32 %v311_v55, %v312_v56  ;;  %v563_v60 = vrot.slane %v562_v57, 1  ;;  %v571_v61 = vadd.f32 %v570_v58, %v569_v54  ;;  %v463_v54 = vld [vmem:[%s1558_s19 + $0x70] sm:$0xff]  ;;  %v466_v56 = vld [vmem:[%s1558_s19 + $0x88] sm:$0xff] }
 0x202   :  { %v1020_v55 = vpack.c.bf16 %v463_v54, %v461_v53  ;;  %v720_v54 = vsub.s32 1, %v1278_v41 }
 0x203   :  { %v314_v62 = vmax.f32 %v313_v59, 0.0  ;;  %v564_v63 = vadd.f32 %v563_v60, %v562_v57  ;;  %v572_v0 = vrot.slane %v571_v61, 1  ;;  %v468_v57 = vld [vmem:[%s1558_s19 + $0x98] sm:$0xff]  ;;  %v465_v59 = vld [vmem:[%s1558_s19 + $0x80] sm:$0xff]  ;;  %v467_v60 = vld [vmem:[%s1558_s19 + $0x90] sm:$0xff] }
 0x204   :  { %v1022_v58 = vpack.c.bf16 %v468_v57, %v466_v56  ;;  %v414_v56 = vand.u32 127, %v202_v40 }
 0x205   :  { %v315_v1 = vadd.f32 1e-05, %v314_v62  ;;  %v565_v2 = vmul.f32 0.125, %v564_v63  ;;  %v573_v4 = vadd.f32 %v572_v0, %v571_v61  ;;  %v1024_v61 = vpack.c.bf16 %v467_v60, %v465_v59  ;;  %v470_v62 = vld [vmem:[%s1558_s19 + $0xa8] sm:$0xff]  ;;  %v472_v63 = vld [vmem:[%s1558_s19 + $0xb8] sm:$0xff] }
 0x206   :  { %v1026_v0 = vpack.c.bf16 %v472_v63, %v470_v62  ;;  %v795_v57 = vadd.s32 128, %v414_v56  ;;  %v854_v63 = vld [vmem:[%s1549_s10] ss:$0 sm:$0xff]  ;;  %vm415_vm4 = vcmp.lt.s32.totalorder %v414_v56, 96  ;;  %s1112_s10 = smov [#allocation2]  }
 0x207   :  { %1045 = vrsqrt.f32 %v315_v1  ;;  %v574_v5 = vmul.f32 0.125, %v573_v4  ;;  %v575_v7 = vmul.f32 %v565_v2, %v565_v2  ;;  %v469_v1 = vld [vmem:[%s1558_s19 + $0xa0] sm:$0xff] }
 0x208   :  { %vm797_vm3 = vcmp.lt.s32.totalorder %v795_v57, 192 }
 0x209   :  { %v576_v8 = vsub.f32 %v574_v5, %v575_v7  ;;  %v474_v5 = vld [vmem:[%s1558_s19 + $0xc8] sm:$0xff]  ;;  %v476_v7 = vld [vmem:[%s1558_s19 + $0xd8] sm:$0xff] }
 0x20b   :  { %v577_v9 = vmax.f32 %v576_v8, 0.0  ;;  %v1030_v8 = vpack.c.bf16 %v476_v7, %v474_v5 }
 0x20d   :  { %v578_v10 = vadd.f32 1e-05, %v577_v9  ;;  %v473_v9 = vld [vmem:[%s1558_s19 + $0xc0] sm:$0xff] }
 0x20f   :  { %1047 = vrsqrt.f32 %v578_v10  ;;  %v475_v10 = vld [vmem:[%s1558_s19 + $0xd0] sm:$0xff] }
 0x211   :  { %v1046_v12 = vpop.eup %1045 }
 0x212   :  { %v317_v13 = vmul.f32 %v1046_v12, %v85_v11  ;;  %v1032_v11 = vpack.c.bf16 %v475_v10, %v473_v9  ;;  %v478_v12 = vld [vmem:[%s1558_s19 + $0xe8] sm:$0xff] }
 0x214   :  { %v318_v15 = vmul.f32 %v317_v13, %v302_v51  ;;  %v324_v16 = vrot.slane %v317_v13, %v1284_v43  ;;  %v464_v51 = vld [vmem:[%s1558_s19 + $0x78] sm:$0xff] }
 0x215   :  { %v1018_v52 = vpack.c.bf16 %v464_v51, %v462_v50  ;;  %v480_v13 = vld [vmem:[%s1558_s19 + $0xf8] sm:$0xff] }
 0x216   :  { %v319_v17 = vsub.f32 %v86_v14, %v318_v15  ;;  %v326_v19 = vmul.f32 %v324_v16, %v291_v23  ;;  %v1034_v14 = vpack.c.bf16 %v480_v13, %v478_v12  ;;  %v477_v15 = vld [vmem:[%s1558_s19 + $0xe0] sm:$0xff]  ;;  %v479_v16 = vld [vmem:[%s1558_s19 + $0xf0] sm:$0xff] }
 0x218   :  { %v331_v20 = vrot.slane %v319_v17, %v1284_v43  ;;  %v1036_v17 = vpack.c.bf16 %v479_v16, %v477_v15 }
 0x219   :  { %v1048_v21 = vpop.eup %1047 }
 0x21a   :  { %v333_v22 = vadd.f32 %v331_v20, %v326_v19  ;;  %v580_v24 = vmul.f32 %v1048_v21, %v436_v18  ;;  %v858_v20 = vld [vmem:[%s1555_s16] ss:$0 sm:$0xff] }
 0x21c   :  { %v581_v25 = vmul.f32 %v580_v24, %v565_v2  ;;  %v587_v26 = vrot.slane %v580_v24, %v1284_v43  ;;  %932 = vmatmul.mubr.msk.f32.vlgmr.msra.gmra.mrb[0].mxu0 %vm294_vm2, %v333_v22  ;;  %v471_v2 = vld [vmem:[%s1558_s19 + $0xb0] sm:$0xff] }
 0x21d   :  { %788 = vmatprep.mubr.f32.mxu0 %v1111_v6  ;;  %v449_v6 = vld [vmem:[%s1558_s19] sm:$0xff]  ;;  %v1028_v4 = vpack.c.bf16 %v471_v2, %v469_v1 }
 0x21e   :  { %v582_v27 = vsub.f32 %v437_v3, %v581_v25  ;;  %v589_v28 = vmul.f32 %v587_v26, %v555_v34  ;;  %v1008_v34 = vpack.c.bf16 %v451_v33, %v449_v6 }
 0x220   :  { %v594_v23 = vrot.slane %v582_v27, %v1284_v43  ;;  %1009 = vmatpush1.bf16.msra.mxu0 %v1008_v34 }
 0x221   :  { %1011 = vmatprep.subr.bf16.mxu0 %v1010_v37 }
 0x222   :  { %v596_v29 = vadd.f32 %v594_v23, %v589_v28 }
 0x224   :  { %962 = vmatmul.mubr.msk.f32.vlgmr.msra.gmra.mrb[6].mxu1 %vm294_vm2, %v596_v29  ;;  %1013 = vmatpush1.bf16.msra.mxu0 %v1012_v42 }
 0x225   :  { %1015 = vmatprep.subr.bf16.mxu0 %v1014_v46 }
 0x228   :  { %1017 = vmatpush1.bf16.msra.mxu0 %v1016_v49 }
 0x229   :  { %1019 = vmatprep.subr.bf16.mxu0 %v1018_v52 }
 0x22c   :  { %1021 = vmatpush1.bf16.msra.mxu0 %v1020_v55  ;;  %v481_v55 = vld [vmem:[%s1559_s20] sm:$0x3]  ;;  %s828_s20 = sshll.u32 %s1112_s10, 4  ;;  %s829_s20 = int_to_ptr.vmem [resolvable:$true] %s828_s20 }
 0x22d   :  { %1023 = vmatprep.subr.bf16.mxu0 %v1022_v58  ;;  %v721_v58 = vrot.slane %v481_v55, %v720_v54  ;;  %v717_v59 = vrot.slane %v481_v55, %v1284_v43  ;;  %s1061_s14 = scalar_lea.vmem %s829_s20, 128  ;;  %p1066_p1 = scmp.lt.s32.totalorder %s829_s20, %s829_s20 }
 0x22e   :  { %p1062_p0 = scmp.ne.s32.totalorder %s829_s20, %s1061_s14  ;;  %p1067_p2 = scmp.lt.s32.totalorder %s1061_s14, %s1061_s14 }
 0x230   :  { %1025 = vmatpush1.bf16.msra.mxu0 %v1024_v61  ;;  %p1068_p3 = por %p1067_p2, %p1066_p1 }
 0x231   :  { %1027 = vmatprep.subr.bf16.mxu0 %v1026_v0 }
 0x232   :  { %p1069_p4 = pnand %p1068_p3, %p1062_p0 }
 0x234   :  { %1029 = vmatpush1.bf16.msra.mxu0 %v1028_v4 }
 0x235   :  { %1031 = vmatprep.subr.bf16.mxu0 %v1030_v8 }
 0x238   :  { %1033 = vmatpush1.bf16.msra.mxu0 %v1032_v11 }
 0x239   :  { %1035 = vmatprep.subr.bf16.mxu0 %v1034_v14 }
 0x23c   :  { %1037 = vmatpush1.bf16.msra.mxu0 %v1036_v17 }
 0x2ef   :  { %v409_v18 = vpop.f32.mrb[0].mxu0 }
 0x2f0   :  { %v933_v19 = vpop.f32.mrb[1].mxu0  ;;  %v410_v2 = vadd.f32 %v854_v63, %v409_v18 }
 0x2f2   :  { %v416_v40 = vsel %vm415_vm4, %v410_v2, -inf }
 0x2f7   :  { %v672_v21 = vpop.f32.mrb[6].mxu1 }
 0x2f8   :  { %v673_v22 = vadd.f32 %v858_v20, %v672_v21  ;;  %v963_v24 = vpop.f32.mrb[7].mxu1 }
 0x2fa   :  { %v676_v3 = vrot.slane %v673_v22, 4  ;;  %v683_v25 = vmul.f32 %v673_v22, %v673_v22 }
 0x2fc   :  { %v677_v26 = vadd.f32 %v676_v3, %v673_v22  ;;  %v684_v27 = vrot.slane %v683_v25, 4 }
 0x2fe   :  { %v678_v28 = vrot.slane %v677_v26, 2  ;;  %v685_v23 = vadd.f32 %v684_v27, %v683_v25 }
 0x300   :  { %v679_v29 = vadd.f32 %v678_v28, %v677_v26  ;;  %v686_v30 = vrot.slane %v685_v23, 2 }
 0x302   :  { %v680_v31 = vrot.slane %v679_v29, 1  ;;  %v687_v32 = vadd.f32 %v686_v30, %v685_v23 }
 0x304   :  { %v681_v6 = vadd.f32 %v680_v31, %v679_v29  ;;  %v688_v33 = vrot.slane %v687_v32, 1 }
 0x306   :  { %v682_v34 = vmul.f32 0.125, %v681_v6  ;;  %v689_v35 = vadd.f32 %v688_v33, %v687_v32 }
 0x308   :  { %v690_v36 = vmul.f32 0.125, %v689_v35  ;;  %v691_v37 = vmul.f32 %v682_v34, %v682_v34 }
 0x30a   :  { %v692_v38 = vsub.f32 %v690_v36, %v691_v37 }
 0x30c   :  { %v693_v39 = vmax.f32 %v692_v38, 0.0 }
 0x30e   :  { %v694_v42 = vadd.f32 1e-05, %v693_v39 }
 0x310   :  { %1049 = vrsqrt.f32 %v694_v42 }
 0x31a   :  { %v1050_v45 = vpop.eup %1049 }
 0x31b   :  { %v696_v46 = vmul.f32 %v1050_v45, %v447_v44 }
 0x31d   :  { %v703_v48 = vrot.slane %v696_v46, %v1284_v43  ;;  %v697_v49 = vmul.f32 %v696_v46, %v682_v34 }
 0x31f   :  { %v698_v50 = vsub.f32 %v448_v47, %v697_v49  ;;  %v705_v51 = vmul.f32 %v703_v48, %v673_v22 }
 0x321   :  { %v710_v52 = vrot.slane %v698_v50, %v1284_v43 }
 0x323   :  { %v712_v53 = vadd.f32 %v710_v52, %v705_v51 }
 0x325   :  { %789 = vmatmul.mubr.f32.vlgmr.msra.gmra.mrb[2].mxu0 %v712_v53 }
 0x3f8   :  { %v790_v60 = vpop.f32.mrb[2].mxu0 }
 0x3f9   :  { %v792_v61 = vpop.f32.mrb[3].mxu0  ;;  %v791_v0 = vadd.f32 %v790_v60, %v717_v59 }
 0x3fa   :  { %v793_v62 = vadd.f32 %v792_v61, %v721_v58 }
 0x3fc   :  { %v799_v41 = vsel %vm797_vm3, %v793_v62, -inf }
 0x3fd   :  { %v800_v1 = vmax.f32 %v791_v0, %v799_v41 }
 0x3ff   :  { %801 = vmax.xlane.f32.xlu0 %v800_v1 }
 0x403   :  { %417 = vmax.xlane.f32.xlu0 %v416_v40 }
 0x48c   :  { %v802_v4 = vpop.xlane.xlu0 %801 }
 0x48d   :  { %v804_v43 = vsub.f32 %v793_v62, %v802_v4  ;;  %v803_v5 = vsub.f32 %v791_v0, %v802_v4 }
 0x48f   :  { %v807_v7 = vmul.f32 1.442695, %v804_v43  ;;  %v805_v10 = vmul.f32 1.442695, %v803_v5 }
 0x490   :  { %v418_v8 = vpop.xlane.xlu0 %417 }
 0x491   :  { %v419_v9 = vsub.f32 %v410_v2, %v418_v8  ;;  %1051 = vpow2.f32 %v807_v7 }
 0x493   :  { %v420_v11 = vmul.f32 1.442695, %v419_v9 }
 0x495   :  { %1053 = vpow2.f32 %v420_v11 }
 0x496   :  { %1055 = vpow2.f32 %v805_v10 }
 0x49b   :  { %v1052_v12 = vpop.eup %1051 }
 0x49c   :  { %v810_v16 = vsel %vm797_vm3, %v1052_v12, 0.0 }
 0x49f   :  { %v1054_v13 = vpop.eup %1053 }
 0x4a0   :  { %v1056_v14 = vpop.eup %1055  ;;  %v422_v15 = vsel %vm415_vm4, %v1054_v13, 0.0 }
 0x4a1   :  { %423 = vadd.xlane.f32.xlu1 %v422_v15  ;;  %v811_v17 = vadd.f32 %v1056_v14, %v810_v16 }
 0x4a5   :  { %812 = vadd.xlane.f32.xlu1 %v811_v17 }
 0x52e   :  { %v424_v18 = vpop.xlane.xlu1 %423 }
 0x52f   :  { %1057 = vrcp.f32 %v424_v18 }
 0x532   :  { %v813_v19 = vpop.xlane.xlu1 %812 }
 0x533   :  { %1059 = vrcp.f32 %v813_v19 }
 0x539   :  { %v1058_v20 = vpop.eup %1057 }
 0x53a   :  { %v426_v21 = vmul.f32 %v1058_v20, %v424_v18 }
 0x53c   :  { %v427_v22 = vsub.f32 2.0, %v426_v21 }
 0x53d   :  { %v1060_v24 = vpop.eup %1059 }
 0x53e   :  { %v815_v3 = vmul.f32 %v1060_v24, %v813_v19  ;;  %v428_v25 = vmul.f32 %v1058_v20, %v427_v22 }
 0x540   :  { %v816_v26 = vsub.f32 2.0, %v815_v3  ;;  %v429_v27 = vmul.f32 %v428_v25, %v422_v15 }
 0x542   :  { %v817_v28 = vmul.f32 %v1060_v24, %v816_v26  ;;  %430 = vst [vmem:[#allocation2] sm:$0xff] %v429_v27 }
 0x543   :  { %1072 = shalt.err (!%p1069_p4)
}
 0x544   :  { %s1073_s4 = scalar_lea.hbm %s1560_s21, 128 }
 0x545   :  { %p1074_p5 = scmp.ne.s32.totalorder %s1560_s21, %s1073_s4  ;;  %p1077_p6 = scmp.lt.u32.totalorder %s1073_s4, %s1560_s21 }
 0x547   :  { %p1079_p7 = pnand %p1077_p6, %p1074_p5 }
 0x549   :  { %1082 = shalt.err (!%p1079_p7)
}
 0x54a   :  { %831 = dma.vmem_to_hbm [thread:$0]  %s829_s20, 128, %s1560_s21, [#allocation3]   ;;  %v818_v23 = vmul.f32 %v1056_v14, %v817_v28  ;;  %v819_v29 = vmul.f32 %v817_v28, %v810_v16 }
 0x54b   :  { %s1083_s24 = scalar_lea.vmem %s839_s28, 256  ;;  %p1088_p9 = scmp.lt.s32.totalorder %s839_s28, %s839_s28 }
 0x54c   :  { %820 = vst [vmem:[#allocation4] sm:$0xff] %v818_v23  ;;  %821 = vst [vmem:[#allocation4 + $0x8] sm:$0xff] %v819_v29  ;;  %p1084_p8 = scmp.ne.s32.totalorder %s839_s28, %s1083_s24  ;;  %p1089_p10 = scmp.lt.s32.totalorder %s1083_s24, %s1083_s24 }
 0x54e   :  { %p1090_p11 = por %p1089_p10, %p1088_p9 }
 0x550   :  { %p1091_p12 = pnand %p1090_p11, %p1084_p8 }
 0x552   :  { %1094 = shalt.err (!%p1091_p12)
}
 0x553   :  { %s1095_s6 = scalar_lea.hbm %s1561_s22, 256 }
 0x554   :  { %p1096_p13 = scmp.ne.s32.totalorder %s1561_s22, %s1095_s6  ;;  %p1099_p0 = scmp.lt.u32.totalorder %s1095_s6, %s1561_s22 }
 0x556   :  { %p1101_p1 = pnand %p1099_p0, %p1096_p13 }
 0x558   :  { %1104 = shalt.err (!%p1101_p1)
}
 0x559   :  { %841 = dma.vmem_to_hbm [thread:$0]  %s839_s28, 256, %s1561_s22, [#allocation5]  }
 0x55a   :  { %1105 = dma.done.wait [#allocation3], 128  }
 0x55b   :  { %1106 = vsyncadd [#allocation3], 4294967168 }
 0x55c   :  { %1107 = dma.done.wait [#allocation5], 256  }
 0x55d   :  { %1108 = vsyncadd [#allocation5], 4294967040 }
 0x55e   :  { %848 = vsyncpa [#allocation3], 1 }
 0x55f   :  { %849 = vsyncpa [#allocation5], 1 }

</bundles_post_ra>
